<compile_context>
chip_gen: v6e
topology: v6e:2x2x1
jax: 0.10.0
libtpu: 0.0.40
codegen_flags: <defaults>
</compile_context>

<pallas_src>
import jax
import jax.numpy as jnp
from jax.experimental import pallas as pl
from jax.experimental.pallas import tpu as pltpu


def _round_up(v, mult):
    return ((v + mult - 1) // mult) * mult


def _matmul_kernel(x_ref, w_ref, o_ref):
    """One (M,N) tile: [tm, K] x [K, tn] on the MXU, f32 accumulation."""
    o_ref[...] = jnp.dot(
        x_ref[...], w_ref[...], preferred_element_type=jnp.float32
    ).astype(o_ref.dtype)


def _activate_weights(weights, act_type, size_in):
    """Hoisted act(W): computed once on the tiny (size_out, size_in) matrix."""
    w = weights.astype(jnp.float32)
    if act_type == "softmax":
        return jax.nn.softmax(w, axis=-1)
    if act_type == "relu":
        return jnp.maximum(w, 0.0)
    if act_type == "leakyrelu":
        return jnp.where(w >= 0.0, w, w * (1.0 / size_in))
    raise ValueError("act type error")


def custom_linear_pallas(x, weights, *, act_type):
    """x: (..., size_in), weights: (size_out, size_in) -> (..., size_out)."""
    size_out, size_in = weights.shape
    lead_shape = x.shape[:-1]
    m = 1
    for d in lead_shape:
        m *= d
    if m == 0:  # degenerate empty batch
        return jnp.zeros((*lead_shape, size_out), dtype=x.dtype)

    # --- hoisted: act(W) once (tiny matrix) + transpose for [M,K]x[K,N] dot --
    w_t = _activate_weights(weights, act_type, size_in).T.astype(x.dtype)

    x2d = x.reshape(m, size_in)
    itemsize = jnp.dtype(x.dtype).itemsize
    sub = max(8, 32 // itemsize)  # sublane pack multiple: 8 f32, 16 bf16, 32 int8

    # --- N tiling: keep W resident unless the layer is wide -----------------
    if size_out > 512:
        tn = 256                   # MXU-width tiles on v6e/v7x; streamed W
    else:
        tn = size_out              # full-dim block -> (8,128) rule waived, masked vst
    grid_n = pl.cdiv(size_out, tn)
    # TODO(synk): add K tiling (f32 VMEM accumulator + pl.when init/finalize)
    # for very large size_in where a full-K W tile no longer fits VMEM.

    # --- M tiling from a VMEM budget (conservative for v7x) -----------------
    vmem_budget = 24 * 1024 * 1024
    w_bytes = 2 * size_in * tn * itemsize          # (double-buffered) W tile
    per_row = 2 * (size_in + tn) * itemsize        # double-buffered x + out rows
    tm_cap = max(sub, max(vmem_budget - w_bytes, per_row) // per_row)
    tm_cap = min(max(sub, (tm_cap // sub) * sub), 2048)

    if m <= tm_cap and m < 512:
        tm = m                     # single full-dim tile (waives sublane rule)
    else:
        tm = tm_cap
        if m >= 512:               # give both v7x TensorCores work (>= 2 tiles)
            tm = min(tm, _round_up(pl.cdiv(m, 2), sub))
        tm = max(sub, (tm // sub) * sub)
    grid_m = pl.cdiv(m, tm)        # non-divisible last block handled by Pallas

    cost = pl.CostEstimate(
        flops=2 * m * size_in * size_out,
        transcendentals=0,
        bytes_accessed=(m * size_in + size_in * size_out + m * size_out) * itemsize,
    )

    out2d = pl.pallas_call(
        _matmul_kernel,
        out_shape=jax.ShapeDtypeStruct((m, size_out), x.dtype),
        grid_spec=pl.GridSpec(
            grid=(grid_m, grid_n),
            in_specs=[
                pl.BlockSpec((tm, size_in), lambda i, j: (i, 0)),  # x tile (pipelined)
                pl.BlockSpec((size_in, tn), lambda i, j: (0, j)),  # W (resident if grid_n==1)
            ],
            out_specs=pl.BlockSpec((tm, tn), lambda i, j: (i, j)),
        ),
        compiler_params=pltpu.CompilerParams(
            dimension_semantics=("parallel", "parallel"),
        ),
        cost_estimate=cost,
    )(x2d, w_t)

    return out2d.reshape(*lead_shape, size_out)


def make_weights(size_in, size_out, act_type, alpha):
    """Deterministic parameter init matching the PyTorch __init__."""
    w = jnp.eye(size_out, size_in, dtype=jnp.float32)
    if act_type == "softmax":
        w = (w * 2.0 - 1.0) * alpha
    return w


def reference_forward(x, weights, act_type, size_in):
    """Pure-JAX reference for correctness check."""
    if act_type == "softmax":
        w_act = jax.nn.softmax(weights, axis=-1)
    elif act_type == "relu":
        w_act = jnp.maximum(weights, 0.0)
    elif act_type == "leakyrelu":
        w_act = jnp.where(weights >= 0.0, weights, weights / size_in)
    else:
        raise ValueError("act type error")
    return jnp.matmul(x, w_act.T)


if __name__ == "__main__":
    alpha = 2.0
    size_in, size_out = 32, 16
    batch, seq = 2, 8

    key = jax.random.PRNGKey(0)
    x = jax.random.normal(key, (batch, seq, size_in), dtype=jnp.float32)

    for act_type in ("softmax", "relu", "leakyrelu"):
        weights = make_weights(size_in, size_out, act_type, alpha)

        out = custom_linear_pallas(x, weights, act_type=act_type)
        out = jax.block_until_ready(out)

        ref = reference_forward(x, weights, act_type, size_in)
        assert out.shape == (batch, seq, size_out)
        assert jnp.allclose(out, ref, atol=1e-5, rtol=1e-5), (
            f"mismatch vs reference for act_type={act_type}"
        )

    print("KERNEL_OK")
</pallas_src>

<mosaic_0001>
module attributes {stable_mosaic.version = 11 : i64} {
  func.func @_matmul_kernel(%arg0: i32, %arg1: i32, %arg2: memref<16x32xf32, #tpu.memory_space<vmem>>, %arg3: memref<32x16xf32, #tpu.memory_space<vmem>>, %arg4: memref<16x16xf32, #tpu.memory_space<vmem>>) attributes {dimension_semantics = [#tpu.dimension_semantics<parallel>, #tpu.dimension_semantics<parallel>], iteration_bounds = array<i64: 1, 1>, scalar_prefetch = 0 : i64, scratch_operands = 0 : i64, tpu.core_type = #tpu.core_type<tc>, window_params = [{transform_indices = @transform_0, window_bounds = array<i64: 16, 32>}, {transform_indices = @transform_1, window_bounds = array<i64: 32, 16>}, {transform_indices = @transform_2, window_bounds = array<i64: 16, 16>}]} {
    %c0 = arith.constant 0 : index
    %c0_0 = arith.constant 0 : index
    %0 = vector.load %arg2[%c0, %c0_0] : memref<16x32xf32, #tpu.memory_space<vmem>>, vector<16x32xf32>
    %c0_1 = arith.constant 0 : index
    %c0_2 = arith.constant 0 : index
    %1 = vector.load %arg3[%c0_1, %c0_2] : memref<32x16xf32, #tpu.memory_space<vmem>>, vector<32x16xf32>
    %cst = arith.constant dense<0.000000e+00> : vector<16x16xf32>
    %2 = tpu.matmul %0, %1, %cst {dimension_numbers = #tpu.dot_dimension_numbers<[1], [0], [0], [1], [0, 0, 1, 1], [], []>} : vector<16x32xf32>, vector<32x16xf32>, vector<16x16xf32> -> vector<16x16xf32>
    %c0_3 = arith.constant 0 : index
    %c0_4 = arith.constant 0 : index
    %3 = vector.load %arg4[%c0_3, %c0_4] : memref<16x16xf32, #tpu.memory_space<vmem>>, vector<16x16xf32>
    tpu.vector_store %arg4[%c0_3, %c0_4], %2 {strides = array<i32>} : memref<16x16xf32, #tpu.memory_space<vmem>>, vector<16x16xf32>,
    return
  }
  func.func @transform_0(%arg0: i32, %arg1: i32) -> (i32, i32) {
    %c0_i32 = arith.constant 0 : i32
    %c0_i32_0 = arith.constant 0 : i32
    return %arg0, %c0_i32 : i32, i32
  }
  func.func @transform_1(%arg0: i32, %arg1: i32) -> (i32, i32) {
    %c0_i32 = arith.constant 0 : i32
    %c0_i32_0 = arith.constant 0 : i32
    return %c0_i32, %arg1 : i32, i32
  }
  func.func @transform_2(%arg0: i32, %arg1: i32) -> (i32, i32) {
    %c0_i32 = arith.constant 0 : i32
    return %arg0, %arg1 : i32, i32
  }
}

</mosaic_0001>

<bundles_post_ra>
// kernel: tpu_custom_call.1
= control target key start
LH: loop header
LB: loop body
LE: loop exit
PB: predicated region body
PF: predicated region fallthrough
CT: control target
= control target key end

     0   :  { %vm18_vm0 = vcmask 261120   ;;  %s202_s0 = inlined_call_operand.vmem [shape: f32[16,32], index: 0, kind: input, shape index: {}]   ;;  %s203_s1 = inlined_call_operand.vmem [shape: f32[32,16], index: 1, kind: input, shape index: {}]   ;;  %s204_s2 = inlined_call_operand.hbm [shape: f32[16,16], index: 2, kind: output, shape index: {}]  }
   0x1   :  { %v17_v0 = vld [vmem:[%s203_s1 + $0x18] sm:$0xff]  ;;  %v16_v1 = vld [vmem:[%s203_s1 + $0x10] sm:$0xff]  ;;  %v12_v2 = vld [vmem:[%s202_s0] sm:$0xff] }
   0x2   :  { %127 = vmatprep.subr.mxu0 %v17_v0  ;;  %v15_v3 = vld [vmem:[%s203_s1 + $0x8] sm:$0xff]  ;;  %135 = vmatprep.mubr.msk.f32.mxu0 %vm18_vm0, %v12_v2 }
   0x3   :  { %128 = vmatpush3.msra.mxu0 %v17_v0 }
   0x4   :  { %7 = vsyncpa [#allocation3], 0  ;;  %129 = vmatprep.subr.mxu0 %v16_v1  ;;  %v14_v4 = vld [vmem:[%s203_s1] sm:$0xff]  ;;  %v13_v5 = vld [vmem:[%s202_s0 + $0x8] sm:$0xff]  ;;  %s163_s21 = smov [#allocation2]   ;;  %vm100_vm1 = vcmask 130048  }
   0x5   :  { %130 = vmatpush3.msra.mxu0 %v16_v1  ;;  %s108_s22 = sshll.u32 %s163_s21, 4  ;;  %s109_s22 = int_to_ptr.vmem [resolvable:$true] %s108_s22 }
   0x6   :  { %131 = vmatprep.subr.mxu0 %v15_v3  ;;  %s141_s23 = scalar_lea.vmem %s109_s22, 256  ;;  %p146_p1 = scmp.lt.s32.totalorder %s109_s22, %s109_s22 }
   0x7   :  { %132 = vmatpush3.msra.mxu0 %v15_v3  ;;  %p142_p0 = scmp.ne.s32.totalorder %s109_s22, %s141_s23  ;;  %p147_p2 = scmp.lt.s32.totalorder %s141_s23, %s141_s23 }
   0x8   :  { %133 = vmatprep.subr.mxu0 %v14_v4 }
   0x9   :  { %134 = vmatpush3.msra.mxu0 %v14_v4  ;;  %p148_p3 = por %p147_p2, %p146_p1 }
   0xa   :  { %136 = vmatmul.mubr.msk.f32.vlgmr.msra.gmra.mxu0 %vm18_vm0, %v13_v5 }
   0xb   :  { %p149_p4 = pnand %p148_p3, %p142_p0 }
  0xca   :  { %v137_v6 = vpop.f32.mrf.mxu0 }
  0xcb   :  { %102 = vst.msk [vmem:[#allocation2 + $0x8] sm:$0xff] %vm100_vm1, %v137_v6 }
  0xcc   :  { %v91_v7 = vpop.f32.mrf.mxu0 }
  0xcd   :  { %101 = vst.msk [vmem:[#allocation2] sm:$0xff] %vm100_vm1, %v91_v7 }
  0xce   :  { %152 = shalt.err (!%p149_p4)
}
  0xcf   :  { %s164_s1 = smov 128   ;;  %s165_s0 = smov 8  }
  0xd0   :  { %114 = dma.vmem_to_hbm [thread:$0]  %s109_s22, 256, %s204_s2, [#allocation3], %s164_s1, %s164_s1, %s165_s0  }
  0xd1   :  { %161 = dma.done.wait [#allocation3], 256  }
  0xd2   :  { %162 = vsyncadd [#allocation3], 4294967040 }
  0xd3   :  { %118 = vsyncpa [#allocation3], 1 }

</bundles_post_ra>
